<compile_context>
chip_gen: v5e
topology: v5e:2x2
jax: 0.10.0
libtpu: 0.0.40
codegen_flags: <defaults>
</compile_context>

<pallas_src>
import functools

import numpy as np
import jax
import jax.numpy as jnp
from jax.experimental import pallas as pl
from jax.experimental.pallas import tpu as pltpu


_LANE = 128
_BIG_C = 1024                    # lane-dense width for the tiled path
_BIG_TILE_R = 512                # (512, 1024) f32 block = 2 MiB
_SINGLE_BLOCK_ELEMS = 1024 * 1024  # <= 4 MiB f32 -> one un-gridded block


# ----------------------------- kernel -------------------------------------
def _interp_kernel(x_lo_ref, x_hi_ref, slope_ref, tau_ref, out_ref, acc_ref,
                   *, y0: float, n_seg: int):
    # Left-endpoint value (also the clamped result for tau < timestamps[0]).
    acc_ref[...] = jnp.full(acc_ref.shape, y0, dtype=acc_ref.dtype)

    # Accumulate each segment's contribution; segment scalars come from SMEM.
    @pl.loop(0, n_seg)
    def _(k):
        x0 = x_lo_ref[k]
        x1 = x_hi_ref[k]
        s = slope_ref[k]
        t = tau_ref[...].astype(jnp.float32)
        acc_ref[...] += s * (jnp.clip(t, x0, x1) - x0)

    out_ref[...] = acc_ref[...].astype(out_ref.dtype)


# ----------------------------- wrapper -------------------------------------
def interpolated_log_temp(tau: jax.Array, timestamps, log_temp) -> jax.Array:
    """Pallas implementation of InterpolatedDiscreteTimeNoiseScheduler.forward."""
    ts = np.asarray(timestamps, dtype=np.float32)
    lt = np.asarray(log_temp, dtype=np.float32)
    assert ts.ndim == 1 and ts.shape == lt.shape and ts.size >= 2
    assert np.all(np.diff(ts) > 0), "timestamps must be strictly increasing"

    # Per-segment constants (fixed at module construction -> host precompute).
    x_lo = jnp.asarray(ts[:-1])
    x_hi = jnp.asarray(ts[1:])
    slope = jnp.asarray((lt[1:] - lt[:-1]) / (ts[1:] - ts[:-1]))
    y0 = float(lt[0])
    n_seg = int(ts.size - 1)

    orig_shape = tau.shape
    io_dtype = tau.dtype if tau.dtype in (jnp.float32, jnp.bfloat16) else jnp.float32

    flat = jnp.ravel(tau).astype(io_dtype)
    n = flat.size
    assert n >= 1

    # Lane-dense 2-D layout.
    if n <= _SINGLE_BLOCK_ELEMS:
        tile_r = None                     # single un-gridded block
        c = _LANE
        rows = pl.cdiv(n, c)
    else:
        tile_r = _BIG_TILE_R
        c = _BIG_C
        rows = pl.cdiv(pl.cdiv(n, c), tile_r) * tile_r

    n_pad = rows * c
    if n_pad != n:
        flat = jnp.pad(flat, (0, n_pad - n))   # pad values are harmless (clipped)
    tau2d = flat.reshape(rows, c)

    kernel = functools.partial(_interp_kernel, y0=y0, n_seg=n_seg)
    smem_spec = pl.BlockSpec(memory_space=pltpu.MemorySpace.SMEM)

    if tile_r is None:
        out2d = pl.pallas_call(
            kernel,
            out_shape=jax.ShapeDtypeStruct((rows, c), io_dtype),
            in_specs=[smem_spec, smem_spec, smem_spec,
                      pl.BlockSpec(memory_space=pltpu.MemorySpace.VMEM)],
            out_specs=pl.BlockSpec(memory_space=pltpu.MemorySpace.VMEM),
            scratch_shapes=[pltpu.VMEM((rows, c), jnp.float32)],
        )(x_lo, x_hi, slope, tau2d)
    else:
        out2d = pl.pallas_call(
            kernel,
            out_shape=jax.ShapeDtypeStruct((rows, c), io_dtype),
            grid=(rows // tile_r,),
            in_specs=[smem_spec, smem_spec, smem_spec,
                      pl.BlockSpec((tile_r, c), lambda i: (i, 0))],
            out_specs=pl.BlockSpec((tile_r, c), lambda i: (i, 0)),
            scratch_shapes=[pltpu.VMEM((tile_r, c), jnp.float32)],
            compiler_params=pltpu.CompilerParams(
                dimension_semantics=("parallel",)),
        )(x_lo, x_hi, slope, tau2d)

    return out2d.reshape(-1)[:n].reshape(orig_shape)


# ----------------------------- demo / check --------------------------------
if __name__ == "__main__":
    # Small discrete schedule, built the way FromDiffusersNoiseScheduler does:
    # timestamps = linspace(0, 1, K); log_temp = log(1 - alpha_bar) - log(alpha_bar)
    K = 17
    timestamps = np.linspace(0.0, 1.0, K).astype(np.float32)
    alpha_bar = (np.cos(0.5 * np.pi * np.linspace(0.02, 0.98, K)) ** 2).astype(np.float32)
    log_temp = (np.log1p(-alpha_bar) - np.log(alpha_bar)).astype(np.float32)

    key = jax.random.PRNGKey(0)
    # tau in [0, 1]: batch=2, seq=8, hidden=32 worth of timesteps.
    tau = jax.random.uniform(key, (2, 8, 32), dtype=jnp.float32)

    out = interpolated_log_temp(tau, timestamps, log_temp)
    out = jax.block_until_ready(out)

    # Pure-JAX reference: 1-D linear interpolation.
    ref = jnp.interp(tau.reshape(-1),
                     jnp.asarray(timestamps),
                     jnp.asarray(log_temp)).reshape(tau.shape)

    assert out.shape == tau.shape and out.dtype == tau.dtype
    assert jnp.allclose(out, ref, rtol=1e-4, atol=1e-4), "mismatch vs jnp.interp reference"

    print("KERNEL_OK")
</pallas_src>

<mosaic_0001>
module attributes {stable_mosaic.version = 11 : i64} {
  func.func @_interp_kernel(%arg0: memref<16xf32, #tpu.memory_space<smem>>, %arg1: memref<16xf32, #tpu.memory_space<smem>>, %arg2: memref<16xf32, #tpu.memory_space<smem>>, %arg3: memref<4x128xf32, #tpu.memory_space<vmem>>, %arg4: memref<4x128xf32, #tpu.memory_space<vmem>>, %arg5: memref<4x128xf32, #tpu.memory_space<vmem>>) attributes {dimension_semantics = [], scalar_prefetch = 0 : i64, scratch_operands = 1 : i64, tpu.core_type = #tpu.core_type<tc>} {
    %cst = arith.constant -6.92022276 : f32
    %0 = vector.broadcast %cst : f32 to vector<4x128xf32>
    %c0 = arith.constant 0 : index
    %c0_0 = arith.constant 0 : index
    %1 = vector.load %arg5[%c0, %c0_0] : memref<4x128xf32, #tpu.memory_space<vmem>>, vector<4x128xf32>
    tpu.vector_store %arg5[%c0, %c0_0], %0 {strides = array<i32>} : memref<4x128xf32, #tpu.memory_space<vmem>>, vector<4x128xf32>,
    %c0_i32 = arith.constant 0 : i32
    %c16_i32 = arith.constant 16 : i32
    %2 = arith.addi %c0_i32, %c16_i32 : i32
    %c1_i32 = arith.constant 1 : i32
    scf.for %arg6 = %c0_i32 to %2 step %c1_i32  : i32 {
      %c1_i32_6 = arith.constant 1 : i32
      %5 = arith.muli %arg6, %c1_i32_6 : i32
      %c0_i32_7 = arith.constant 0 : i32
      %6 = arith.addi %c0_i32_7, %5 : i32
      %7 = arith.index_cast %6 : i32 to index
      %8 = memref.load %arg0[%7] : memref<16xf32, #tpu.memory_space<smem>>
      %9 = arith.index_cast %6 : i32 to index
      %10 = memref.load %arg1[%9] : memref<16xf32, #tpu.memory_space<smem>>
      %11 = arith.index_cast %6 : i32 to index
      %12 = memref.load %arg2[%11] : memref<16xf32, #tpu.memory_space<smem>>
      %c0_8 = arith.constant 0 : index
      %c0_9 = arith.constant 0 : index
      %13 = vector.load %arg3[%c0_8, %c0_9] : memref<4x128xf32, #tpu.memory_space<vmem>>, vector<4x128xf32>
      %c0_10 = arith.constant 0 : index
      %c0_11 = arith.constant 0 : index
      %14 = vector.load %arg5[%c0_10, %c0_11] : memref<4x128xf32, #tpu.memory_space<vmem>>, vector<4x128xf32>
      %15 = vector.broadcast %8 : f32 to vector<4x128xf32>
      %16 = arith.maximumf %15, %13 : vector<4x128xf32>
      %17 = vector.broadcast %10 : f32 to vector<4x128xf32>
      %18 = arith.minimumf %17, %16 : vector<4x128xf32>
      %19 = vector.broadcast %8 : f32 to vector<4x128xf32>
      %20 = arith.subf %18, %19 : vector<4x128xf32>
      %21 = vector.broadcast %12 : f32 to vector<4x128xf32>
      %22 = arith.mulf %21, %20 : vector<4x128xf32>
      %23 = arith.addf %14, %22 : vector<4x128xf32>
      %c0_12 = arith.constant 0 : index
      %c0_13 = arith.constant 0 : index
      %24 = vector.load %arg5[%c0_12, %c0_13] : memref<4x128xf32, #tpu.memory_space<vmem>>, vector<4x128xf32>
      tpu.vector_store %arg5[%c0_12, %c0_13], %23 {strides = array<i32>} : memref<4x128xf32, #tpu.memory_space<vmem>>, vector<4x128xf32>,
    }
    %c16_i32_1 = arith.constant 16 : i32
    %c0_2 = arith.constant 0 : index
    %c0_3 = arith.constant 0 : index
    %3 = vector.load %arg5[%c0_2, %c0_3] : memref<4x128xf32, #tpu.memory_space<vmem>>, vector<4x128xf32>
    %c0_4 = arith.constant 0 : index
    %c0_5 = arith.constant 0 : index
    %4 = vector.load %arg4[%c0_4, %c0_5] : memref<4x128xf32, #tpu.memory_space<vmem>>, vector<4x128xf32>
    tpu.vector_store %arg4[%c0_4, %c0_5], %3 {strides = array<i32>} : memref<4x128xf32, #tpu.memory_space<vmem>>, vector<4x128xf32>,
    return
  }
}

</mosaic_0001>

<bundles_post_ra>
// kernel: tpu_custom_call.1
= control target key start
LH: loop header
LB: loop body
LE: loop exit
PB: predicated region body
PF: predicated region fallthrough
CT: control target
= control target key end

     0   :  { %9 = vsyncpa [#allocation6], 0  ;;  %s279_s0 = inlined_call_operand.hbm [shape: f32[16], index: 0, kind: input, shape index: {}]   ;;  %s280_s1 = inlined_call_operand.hbm [shape: f32[16], index: 1, kind: input, shape index: {}]   ;;  %s281_s2 = inlined_call_operand.vmem [shape: f32[16], index: 2, kind: input, shape index: {}]   ;;  %s282_s3 = inlined_call_operand.hbm [shape: f32[4,128], index: 3, kind: input, shape index: {}]   ;;  %s283_s4 = inlined_call_operand.hbm [shape: f32[4,128], index: 4, kind: output, shape index: {}]  }
   0x1   :  { %10 = vsyncpa [#allocation9], 0 }
   0x2   :  { %11 = vsyncpa [#allocation7], 0 }
   0x3   :  { %12 = vsyncpa [#allocation4], 0 }
   0x4   :  { %13 = vsyncpa [#allocation5], 0  ;;  %s19_s17 = sshll.u32 %s279_s0, 4  ;;  %s28_s20 = sshll.u32 %s280_s1, 4  ;;  %s20_s17 = int_to_ptr.hbm [resolvable:$true] %s19_s17  ;;  %s29_s20 = int_to_ptr.hbm [resolvable:$true] %s28_s20 }
   0x5   :  { %s233_s21 = smov [#allocation3]   ;;  %s234_s22 = smov [#allocation8]  }
   0x6   :  { %22 = dma.hbm_to_smem %s20_s17, 16, %s233_s21, [#allocation6]  }
   0x7   :  { %31 = dma.hbm_to_smem %s29_s20, 16, %s234_s22, [#allocation9]  }
   0x8   :  { %s37_s25 = sshll.u32 %s281_s2, 4  ;;  %s46_s28 = sshll.u32 %s282_s3, 4  ;;  %s38_s25 = int_to_ptr.vmem [resolvable:$true] %s37_s25  ;;  %s47_s28 = int_to_ptr.hbm [resolvable:$true] %s46_s28 }
   0x9   :  { %s235_s0 = smov [#allocation10]   ;;  %s236_s29 = smov [#allocation11]  }
   0xa   :  { %40 = dma.vmem_to_smem %s38_s25, 16, %s235_s0, [#allocation7]  }
   0xb   :  { %s48_s30 = sshll.u32 %s236_s29, 4  ;;  %s49_s30 = int_to_ptr.vmem [resolvable:$true] %s48_s30 }
   0xc   :  { %51 = dma.hbm_to_vmem [thread:$0]  %s47_s28, 64, %s49_s30, [#allocation4]  }
   0xd   :  { %219 = dma.done.wait [#allocation6], 16  }
   0xe   :  { %220 = vsyncadd [#allocation6], 4294967280 }
   0xf   :  { %221 = dma.done.wait [#allocation9], 16  }
  0x10   :  { %222 = vsyncadd [#allocation9], 4294967280 }
  0x11   :  { %223 = dma.done.wait [#allocation7], 16  }
  0x12   :  { %224 = vsyncadd [#allocation7], 4294967280 }
  0x13   :  { %225 = dma.done.wait [#allocation4], 64  }
  0x14   :  { %226 = vsyncadd [#allocation4], 4294967232 }
  0x15   :  { %68 = sfence }
  0x16   :  { %v237_v0 = vmov -6.9202228   ;;  %s229_s1 = smov 0  }
  0x17   :  { %69 = vst [vmem:[#allocation2] sm:$0xf] %v237_v0 }
  0x18 LB: > { %s76_s2 = sld [smem:[#allocation3 + %s231_s1]]  ;;  %v79_v1 = vld [vmem:[#allocation11] sm:$0xf]  ;;  %s231_s1 = sphi %s229_s1, %s75_s1  }
  0x19   : > { %s77_s3 = sld [smem:[#allocation8 + %s231_s1]] }
  0x1a   : > { %s78_s5 = sld [smem:[#allocation10 + %s231_s1]]  ;;  %s75_s1 = sadd.s32 1, %s231_s1  }
  0x1b   : > { %p72_p0 = scmp.ge.s32.totalorder %s75_s1, 16  }
  0x1c   :  { %s99_s8 = sshll.u32 (%p72_p0), %s283_s4, 4  ;;  %s238_s9 = smov (%p72_p0), [#allocation12]   ;;  %s100_s8 = int_to_ptr.hbm [resolvable:$true] %s99_s8 }
  0x1d   :  { %s97_s10 = sshll.u32 (%p72_p0), %s238_s9, 4  ;;  %s98_s10 = int_to_ptr.vmem [resolvable:$true] %s97_s10 }
  0x1e   : > { %v81_v2 = vstv %s76_s2  ;;  %v80_v8 = vld [vmem:[#allocation2] sm:$0xf] }
  0x1f   : > { %v82_v3 = vmax.f32 %v81_v2, %v79_v1  ;;  %v83_v4 = vstv %s77_s3 }
  0x20   : > { %v86_v6 = vstv %s78_s5 }
  0x21   : > { %v84_v5 = vmin.f32 %v83_v4, %v82_v3 }
  0x23   : > { %v85_v7 = vsub.f32 %v84_v5, %v81_v2 }
  0x25   : > { %v87_v9 = vmul.f32 %v86_v6, %v85_v7  ;;  %74 = sbr.rel (!%p72_p0) target bundleno = 24 (0x18), region = 59 }
  0x27   : > { %v88_v10 = vadd.f32 %v87_v9, %v80_v8 }
  0x29   : > { %89 = vst [vmem:[#allocation2] sm:$0xf] %v88_v10 }
  0x30   :  { %v90_v11 = vld [vmem:[#allocation2] sm:$0xf] }
  0x31   :  { %91 = vst [vmem:[#allocation12] sm:$0xf] %v90_v11 }
  0x32   :  { %102 = dma.vmem_to_hbm [thread:$0]  %s98_s10, 64, %s100_s8, [#allocation5]  }
  0x33   :  { %227 = dma.done.wait [#allocation5], 64  }
  0x34   :  { %228 = vsyncadd [#allocation5], 4294967232 }
  0x35   :  { %107 = vsyncpa [#allocation4], 1 }
  0x36   :  { %108 = vsyncpa [#allocation5], 1 }
  0x37   :  { %109 = vsyncpa [#allocation6], 1 }
  0x38   :  { %110 = vsyncpa [#allocation9], 1 }
  0x39   :  { %111 = vsyncpa [#allocation7], 1 }

</bundles_post_ra>
